<compile_context>
chip_gen: v7x
topology: tpu7x:2x2x1
jax: 0.10.0
libtpu: 0.0.40
codegen_flags: <defaults>
</compile_context>

<pallas_src>
import functools

import jax
import jax.numpy as jnp
from jax.experimental import pallas as pl
from jax.experimental.pallas import tpu as pltpu


# ----------------------------------------------------------------------------
# Path A kernel: dense-slab layout for small channel counts.
#   x_ref, o_ref : (TN, C, TR, 128) in VMEM   (per-channel slabs fully dense)
#   w_ref        : (C_out, C_in)    in SMEM   (scalar reads)
#   b_ref        : (C_out,)         in SMEM
# ----------------------------------------------------------------------------
def _pa_kernel_slab(x_ref, w_ref, b_ref, o_ref):
    x = x_ref[...]                          # input dtype
    xf = x.astype(jnp.float32)              # f32 accumulation path (v5e-safe)
    c_out, c_in = w_ref.shape
    for o in range(c_out):
        # Bias folded into the first multiply-add pass (no separate add pass).
        acc = xf[:, 0] * w_ref[o, 0] + b_ref[o]
        for c in range(1, c_in):
            acc = acc + xf[:, c] * w_ref[o, c]
        attn = jax.nn.sigmoid(acc)          # f32 on the EUP slot
        # Gating multiply in the input dtype (bf16 epilogue on v6e/v7x;
        # exact no-op cast for f32 inputs).
        o_ref[:, o, :, :] = (x[:, o] * attn.astype(x.dtype)).astype(o_ref.dtype)


# ----------------------------------------------------------------------------
# Path B kernel: (1, C, TILE_P) blocks; MXU matmul for wide C, VPU FMAs else.
#   x_ref, o_ref : (1, C, TILE_P) in VMEM
#   w_ref        : (C_out, C_in)  in VMEM
#   b_ref        : (C_out, 1)     in VMEM
# ----------------------------------------------------------------------------
def _pa_kernel_flat(x_ref, w_ref, b_ref, o_ref, *, use_mxu):
    x = x_ref[0]                                        # (C_in, TILE_P)
    bf = b_ref[...].astype(jnp.float32)                 # (C_out, 1)
    if use_mxu:
        # One small matmul on the MXU slot; bf16 operands when the input is
        # bf16 (v6e/v7x full-rate), f32 accumulation always.
        mxu_dt = jnp.bfloat16 if x.dtype == jnp.bfloat16 else jnp.float32
        y = jnp.dot(w_ref[...].astype(mxu_dt), x.astype(mxu_dt),
                    preferred_element_type=jnp.float32) + bf
    else:
        xf = x.astype(jnp.float32)
        wf = w_ref[...].astype(jnp.float32)
        c_in = wf.shape[1]
        acc = wf[:, 0:1] * xf[0:1, :] + bf              # bias folded in
        for c in range(1, c_in):
            acc = acc + wf[:, c:c + 1] * xf[c:c + 1, :]
        y = acc
    attn = jax.nn.sigmoid(y)                            # f32 on the EUP
    o_ref[0] = (x * attn.astype(x.dtype)).astype(o_ref.dtype)


# ----------------------------------------------------------------------------
# Tiling policy helpers.
# ----------------------------------------------------------------------------
def _budgets():
    """(max_block_bytes, vmem_limit_bytes) tuned per TPU generation."""
    kind = ""
    try:
        kind = jax.devices()[0].device_kind.lower()
    except Exception:
        pass
    if "v5" in kind:
        # v5e: 128 MiB physical VMEM but only a 16 MiB scoped default, so the
        # explicit limit below is required; HBM ~820 GB/s -> modest tiles fine.
        return 4 * 1024 * 1024, 32 * 1024 * 1024
    if "v6" in kind:
        # v6e: 128 MiB physical VMEM, ~1.4 TB/s HBM -> large tiles amortize
        # per-step overhead toward the HBM roofline.
        return 6 * 1024 * 1024, 64 * 1024 * 1024
    # v7x (64 MiB physical VMEM, ~3.2 TB/s HBM) and unknown chips: large tiles
    # but leave headroom for double-buffered in+out plus f32 temporaries.
    return 4 * 1024 * 1024, 44 * 1024 * 1024


def _choose_rows(R, bytes_per_row, max_block_bytes):
    """Row-tile (sublane axis) for path A: multiple of 8 or the full extent.

    Only accept an exact divisor if it is >= cap//2; otherwise use the cap and
    let Pallas mask the ragged last block (avoids the tiny-tile perf cliff)."""
    cap = max(8, (max_block_bytes // max(1, bytes_per_row)) // 8 * 8)
    if R <= cap:
        return R
    t = cap
    while t >= max(8, cap // 2):
        if R % t == 0:
            return t
        t -= 8
    return cap                          # ragged tail; OOB stores are masked


def _choose_tile_p(P, bytes_per_col, max_block_bytes):
    """Pixel-tile (lane axis) for path B: multiple of 128 or the full extent.

    Same policy: never degrade to tiny exact divisors."""
    cap = max(128, (max_block_bytes // max(1, bytes_per_col)) // 128 * 128)
    if P <= cap:
        return P
    t = cap
    while t >= max(128, cap // 2):
        if P % t == 0:
            return t
        t -= 128
    return cap                          # ragged tail; OOB stores are masked


# ----------------------------------------------------------------------------
# Public forward.
# ----------------------------------------------------------------------------
def pa_forward(x_nchw, weight, bias, *, max_block_bytes=None, vmem_limit_bytes=None):
    """Pixel attention forward.

    x_nchw : (N, C, H, W)          -- PyTorch NCHW input
    weight : (C_out, C_in, 1, 1)   -- PyTorch Conv2d weight layout
    bias   : (C_out,)
    """
    N, C, H, W = x_nchw.shape
    C_out, C_in = int(weight.shape[0]), int(weight.shape[1])
    # PA gates x with a same-width 1x1 conv; square is required for x * y.
    assert C_in == C and C_out == C, "PA requires Conv2d(nf, nf, 1)"
    P = H * W
    itemsize = x_nchw.dtype.itemsize

    if max_block_bytes is None or vmem_limit_bytes is None:
        mb, vl = _budgets()
        max_block_bytes = max_block_bytes or mb
        vmem_limit_bytes = vmem_limit_bytes or vl

    w2 = weight[:, :, 0, 0]                       # (C_out, C_in)
    compiler_params = pltpu.CompilerParams(
        dimension_semantics=("parallel", "parallel"),   # shard over v7x's 2 TCs
        vmem_limit_bytes=vmem_limit_bytes,
    )

    use_slab = (C < 16) and (P % 128 == 0)

    if use_slab:
        # --------------------- Path A: dense-slab layout ---------------------
        R = P // 128
        x = x_nchw.reshape(N, C, R, 128)          # pure reshape, no data movement
        bytes_per_row = C * 128 * itemsize        # one row across channels, 1 sample
        tile_r = _choose_rows(R, bytes_per_row, max_block_bytes)

        tile_n = 1
        if tile_r == R:
            # Small feature map: batch samples into one block to amortize the
            # fixed per-grid-step cost.
            sample_bytes = C * R * 128 * itemsize
            tile_n = int(max(1, min(N, max_block_bytes // max(1, sample_bytes))))

        grid = (pl.cdiv(N, tile_n), pl.cdiv(R, tile_r))

        w_s = w2.astype(jnp.float32)              # SMEM scalar tables (f32)
        b_s = bias.astype(jnp.float32)            # (C_out,)

        out = pl.pallas_call(
            _pa_kernel_slab,
            out_shape=jax.ShapeDtypeStruct((N, C, R, 128), x.dtype),
            grid_spec=pltpu.PrefetchScalarGridSpec(
                num_scalar_prefetch=0,
                grid=grid,
                in_specs=[
                    pl.BlockSpec((tile_n, C, tile_r, 128),
                                 lambda n, r: (n, 0, r, 0)),
                    pl.BlockSpec(memory_space=pltpu.MemorySpace.SMEM),   # weight
                    pl.BlockSpec(memory_space=pltpu.MemorySpace.SMEM),   # bias
                ],
                out_specs=pl.BlockSpec((tile_n, C, tile_r, 128),
                                       lambda n, r: (n, 0, r, 0)),
            ),
            compiler_params=compiler_params,
        )(x, w_s, b_s)
        return out.reshape(N, C, H, W)

    # ------------------------- Path B: flat pixel axis -----------------------
    x = x_nchw.reshape(N, C, P)                   # pure reshape
    tile_p = _choose_tile_p(P, C * itemsize, max_block_bytes)
    grid = (N, pl.cdiv(P, tile_p))
    kernel = functools.partial(_pa_kernel_flat, use_mxu=(C >= 16))

    out = pl.pallas_call(
        kernel,
        out_shape=jax.ShapeDtypeStruct((N, C, P), x.dtype),
        grid_spec=pltpu.PrefetchScalarGridSpec(
            num_scalar_prefetch=0,
            grid=grid,
            in_specs=[
                pl.BlockSpec((1, C, tile_p), lambda n, t: (n, 0, t)),   # x tile
                pl.BlockSpec((C, C), lambda n, t: (0, 0)),              # weight
                pl.BlockSpec((C, 1), lambda n, t: (0, 0)),              # bias
            ],
            out_specs=pl.BlockSpec((1, C, tile_p), lambda n, t: (n, 0, t)),
        ),
        compiler_params=compiler_params,
    )(x, w2, bias.reshape(C_out, 1))
    return out.reshape(N, C, H, W)


def pa_reference(x_nchw, weight, bias):
    """Pure-JAX reference matching torch semantics (1x1 conv, sigmoid, mul)."""
    y = jnp.einsum("oc,nchw->nohw", weight[:, :, 0, 0], x_nchw) + bias[None, :, None, None]
    return x_nchw * jax.nn.sigmoid(y)


def _check(N, C, H, W, key, atol=1e-5):
    k_x, k_w, k_b = jax.random.split(key, 3)
    x = jax.random.normal(k_x, (N, C, H, W), dtype=jnp.float32)
    weight = jax.random.normal(k_w, (C, C, 1, 1), dtype=jnp.float32) * 0.1
    bias = jax.random.normal(k_b, (C,), dtype=jnp.float32) * 0.1
    out = jax.block_until_ready(pa_forward(x, weight, bias))
    ref = pa_reference(x, weight, bias)
    assert out.shape == (N, C, H, W)
    assert jnp.allclose(out, ref, atol=atol, rtol=atol), f"mismatch at C={C},H={H},W={W}"
    return out


if __name__ == "__main__":
    key = jax.random.PRNGKey(0)
    k0, k1, k2 = jax.random.split(key, 3)

    # Main case (matches PA(nf=4)): exercises path A (dense-slab layout).
    _check(2, 4, 16, 16, k0)

    # Ragged spatial size (H*W not a multiple of 128): path B, unrolled FMA.
    _check(2, 8, 10, 10, k1)

    # Wider channels: path B with the MXU contraction.
    _check(1, 16, 16, 8, k2)

    print("KERNEL_OK")
</pallas_src>

<mosaic_0001>
module attributes {stable_mosaic.version = 11 : i64} {
  func.func @_pa_kernel_slab(%arg0: i32, %arg1: i32, %arg2: memref<2x4x2x128xf32, #tpu.memory_space<vmem>>, %arg3: memref<4x4xf32, #tpu.memory_space<smem>>, %arg4: memref<4xf32, #tpu.memory_space<smem>>, %arg5: memref<2x4x2x128xf32, #tpu.memory_space<vmem>>) attributes {dimension_semantics = [#tpu.dimension_semantics<parallel>, #tpu.dimension_semantics<parallel>], iteration_bounds = array<i64: 1, 1>, scalar_prefetch = 0 : i64, scratch_operands = 0 : i64, tpu.core_type = #tpu.core_type<tc>, window_params = [{transform_indices = @transform_0, window_bounds = array<i64: 2, 4, 2, 128>}, {transform_indices = @transform_1, window_bounds = array<i64: 4, 4>}, {transform_indices = @transform_2, window_bounds = array<i64: 4>}, {transform_indices = @transform_3, window_bounds = array<i64: 2, 4, 2, 128>}]} {
    %c0 = arith.constant 0 : index
    %c0_0 = arith.constant 0 : index
    %c0_1 = arith.constant 0 : index
    %c0_2 = arith.constant 0 : index
    %0 = vector.load %arg2[%c0, %c0_0, %c0_1, %c0_2] : memref<2x4x2x128xf32, #tpu.memory_space<vmem>>, vector<2x4x2x128xf32>
    %1 = vector.extract_strided_slice %0 {offsets = [0, 0, 0, 0], sizes = [2, 1, 2, 128], strides = [1, 1, 1, 1]} : vector<2x4x2x128xf32> to vector<2x1x2x128xf32>
    %2 = vector.shape_cast %1 : vector<2x1x2x128xf32> to vector<2x2x128xf32>
    %c0_3 = arith.constant 0 : index
    %c0_4 = arith.constant 0 : index
    %3 = memref.load %arg3[%c0_3, %c0_4] : memref<4x4xf32, #tpu.memory_space<smem>>
    %4 = vector.broadcast %3 : f32 to vector<2x2x128xf32>
    %5 = arith.mulf %2, %4 : vector<2x2x128xf32>
    %c0_5 = arith.constant 0 : index
    %6 = memref.load %arg4[%c0_5] : memref<4xf32, #tpu.memory_space<smem>>
    %7 = vector.broadcast %6 : f32 to vector<2x2x128xf32>
    %8 = arith.addf %5, %7 : vector<2x2x128xf32>
    %9 = vector.extract_strided_slice %0 {offsets = [0, 1, 0, 0], sizes = [2, 1, 2, 128], strides = [1, 1, 1, 1]} : vector<2x4x2x128xf32> to vector<2x1x2x128xf32>
    %10 = vector.shape_cast %9 : vector<2x1x2x128xf32> to vector<2x2x128xf32>
    %c0_6 = arith.constant 0 : index
    %c1 = arith.constant 1 : index
    %11 = memref.load %arg3[%c0_6, %c1] : memref<4x4xf32, #tpu.memory_space<smem>>
    %12 = vector.broadcast %11 : f32 to vector<2x2x128xf32>
    %13 = arith.mulf %10, %12 : vector<2x2x128xf32>
    %14 = arith.addf %8, %13 : vector<2x2x128xf32>
    %15 = vector.extract_strided_slice %0 {offsets = [0, 2, 0, 0], sizes = [2, 1, 2, 128], strides = [1, 1, 1, 1]} : vector<2x4x2x128xf32> to vector<2x1x2x128xf32>
    %16 = vector.shape_cast %15 : vector<2x1x2x128xf32> to vector<2x2x128xf32>
    %c0_7 = arith.constant 0 : index
    %c2 = arith.constant 2 : index
    %17 = memref.load %arg3[%c0_7, %c2] : memref<4x4xf32, #tpu.memory_space<smem>>
    %18 = vector.broadcast %17 : f32 to vector<2x2x128xf32>
    %19 = arith.mulf %16, %18 : vector<2x2x128xf32>
    %20 = arith.addf %14, %19 : vector<2x2x128xf32>
    %21 = vector.extract_strided_slice %0 {offsets = [0, 3, 0, 0], sizes = [2, 1, 2, 128], strides = [1, 1, 1, 1]} : vector<2x4x2x128xf32> to vector<2x1x2x128xf32>
    %22 = vector.shape_cast %21 : vector<2x1x2x128xf32> to vector<2x2x128xf32>
    %c0_8 = arith.constant 0 : index
    %c3 = arith.constant 3 : index
    %23 = memref.load %arg3[%c0_8, %c3] : memref<4x4xf32, #tpu.memory_space<smem>>
    %24 = vector.broadcast %23 : f32 to vector<2x2x128xf32>
    %25 = arith.mulf %22, %24 : vector<2x2x128xf32>
    %26 = arith.addf %20, %25 : vector<2x2x128xf32>
    %27 = arith.negf %26 : vector<2x2x128xf32>
    %28 = math.exp %27 : vector<2x2x128xf32>
    %cst = arith.constant 1.000000e+00 : f32
    %29 = vector.broadcast %cst : f32 to vector<2x2x128xf32>
    %30 = arith.addf %29, %28 : vector<2x2x128xf32>
    %31 = arith.divf %29, %30 : vector<2x2x128xf32>
    %32 = vector.extract_strided_slice %0 {offsets = [0, 0, 0, 0], sizes = [2, 1, 2, 128], strides = [1, 1, 1, 1]} : vector<2x4x2x128xf32> to vector<2x1x2x128xf32>
    %33 = vector.shape_cast %32 : vector<2x1x2x128xf32> to vector<2x2x128xf32>
    %34 = arith.mulf %33, %31 : vector<2x2x128xf32>
    %c0_9 = arith.constant 0 : index
    %c0_10 = arith.constant 0 : index
    %c0_11 = arith.constant 0 : index
    %c0_12 = arith.constant 0 : index
    %35 = vector.load %arg5[%c0_9, %c0_10, %c0_11, %c0_12] : memref<2x4x2x128xf32, #tpu.memory_space<vmem>>, vector<2x1x2x128xf32>
    %36 = vector.shape_cast %35 : vector<2x1x2x128xf32> to vector<2x2x128xf32>
    %37 = vector.shape_cast %34 : vector<2x2x128xf32> to vector<2x1x2x128xf32>
    tpu.vector_store %arg5[%c0_9, %c0_10, %c0_11, %c0_12], %37 {strides = array<i32>} : memref<2x4x2x128xf32, #tpu.memory_space<vmem>>, vector<2x1x2x128xf32>,
    %38 = vector.extract_strided_slice %0 {offsets = [0, 0, 0, 0], sizes = [2, 1, 2, 128], strides = [1, 1, 1, 1]} : vector<2x4x2x128xf32> to vector<2x1x2x128xf32>
    %39 = vector.shape_cast %38 : vector<2x1x2x128xf32> to vector<2x2x128xf32>
    %c1_13 = arith.constant 1 : index
    %c0_14 = arith.constant 0 : index
    %40 = memref.load %arg3[%c1_13, %c0_14] : memref<4x4xf32, #tpu.memory_space<smem>>
    %41 = vector.broadcast %40 : f32 to vector<2x2x128xf32>
    %42 = arith.mulf %39, %41 : vector<2x2x128xf32>
    %c1_15 = arith.constant 1 : index
    %43 = memref.load %arg4[%c1_15] : memref<4xf32, #tpu.memory_space<smem>>
    %44 = vector.broadcast %43 : f32 to vector<2x2x128xf32>
    %45 = arith.addf %42, %44 : vector<2x2x128xf32>
    %46 = vector.extract_strided_slice %0 {offsets = [0, 1, 0, 0], sizes = [2, 1, 2, 128], strides = [1, 1, 1, 1]} : vector<2x4x2x128xf32> to vector<2x1x2x128xf32>
    %47 = vector.shape_cast %46 : vector<2x1x2x128xf32> to vector<2x2x128xf32>
    %c1_16 = arith.constant 1 : index
    %c1_17 = arith.constant 1 : index
    %48 = memref.load %arg3[%c1_16, %c1_17] : memref<4x4xf32, #tpu.memory_space<smem>>
    %49 = vector.broadcast %48 : f32 to vector<2x2x128xf32>
    %50 = arith.mulf %47, %49 : vector<2x2x128xf32>
    %51 = arith.addf %45, %50 : vector<2x2x128xf32>
    %52 = vector.extract_strided_slice %0 {offsets = [0, 2, 0, 0], sizes = [2, 1, 2, 128], strides = [1, 1, 1, 1]} : vector<2x4x2x128xf32> to vector<2x1x2x128xf32>
    %53 = vector.shape_cast %52 : vector<2x1x2x128xf32> to vector<2x2x128xf32>
    %c1_18 = arith.constant 1 : index
    %c2_19 = arith.constant 2 : index
    %54 = memref.load %arg3[%c1_18, %c2_19] : memref<4x4xf32, #tpu.memory_space<smem>>
    %55 = vector.broadcast %54 : f32 to vector<2x2x128xf32>
    %56 = arith.mulf %53, %55 : vector<2x2x128xf32>
    %57 = arith.addf %51, %56 : vector<2x2x128xf32>
    %58 = vector.extract_strided_slice %0 {offsets = [0, 3, 0, 0], sizes = [2, 1, 2, 128], strides = [1, 1, 1, 1]} : vector<2x4x2x128xf32> to vector<2x1x2x128xf32>
    %59 = vector.shape_cast %58 : vector<2x1x2x128xf32> to vector<2x2x128xf32>
    %c1_20 = arith.constant 1 : index
    %c3_21 = arith.constant 3 : index
    %60 = memref.load %arg3[%c1_20, %c3_21] : memref<4x4xf32, #tpu.memory_space<smem>>
    %61 = vector.broadcast %60 : f32 to vector<2x2x128xf32>
    %62 = arith.mulf %59, %61 : vector<2x2x128xf32>
    %63 = arith.addf %57, %62 : vector<2x2x128xf32>
    %64 = arith.negf %63 : vector<2x2x128xf32>
    %65 = math.exp %64 : vector<2x2x128xf32>
    %cst_22 = arith.constant 1.000000e+00 : f32
    %66 = vector.broadcast %cst_22 : f32 to vector<2x2x128xf32>
    %67 = arith.addf %66, %65 : vector<2x2x128xf32>
    %68 = arith.divf %66, %67 : vector<2x2x128xf32>
    %69 = vector.extract_strided_slice %0 {offsets = [0, 1, 0, 0], sizes = [2, 1, 2, 128], strides = [1, 1, 1, 1]} : vector<2x4x2x128xf32> to vector<2x1x2x128xf32>
    %70 = vector.shape_cast %69 : vector<2x1x2x128xf32> to vector<2x2x128xf32>
    %71 = arith.mulf %70, %68 : vector<2x2x128xf32>
    %c0_23 = arith.constant 0 : index
    %c1_24 = arith.constant 1 : index
    %c0_25 = arith.constant 0 : index
    %c0_26 = arith.constant 0 : index
    %72 = vector.load %arg5[%c0_23, %c1_24, %c0_25, %c0_26] : memref<2x4x2x128xf32, #tpu.memory_space<vmem>>, vector<2x1x2x128xf32>
    %73 = vector.shape_cast %72 : vector<2x1x2x128xf32> to vector<2x2x128xf32>
    %74 = vector.shape_cast %71 : vector<2x2x128xf32> to vector<2x1x2x128xf32>
    tpu.vector_store %arg5[%c0_23, %c1_24, %c0_25, %c0_26], %74 {strides = array<i32>} : memref<2x4x2x128xf32, #tpu.memory_space<vmem>>, vector<2x1x2x128xf32>,
    %75 = vector.extract_strided_slice %0 {offsets = [0, 0, 0, 0], sizes = [2, 1, 2, 128], strides = [1, 1, 1, 1]} : vector<2x4x2x128xf32> to vector<2x1x2x128xf32>
    %76 = vector.shape_cast %75 : vector<2x1x2x128xf32> to vector<2x2x128xf32>
    %c2_27 = arith.constant 2 : index
    %c0_28 = arith.constant 0 : index
    %77 = memref.load %arg3[%c2_27, %c0_28] : memref<4x4xf32, #tpu.memory_space<smem>>
    %78 = vector.broadcast %77 : f32 to vector<2x2x128xf32>
    %79 = arith.mulf %76, %78 : vector<2x2x128xf32>
    %c2_29 = arith.constant 2 : index
    %80 = memref.load %arg4[%c2_29] : memref<4xf32, #tpu.memory_space<smem>>
    %81 = vector.broadcast %80 : f32 to vector<2x2x128xf32>
    %82 = arith.addf %79, %81 : vector<2x2x128xf32>
    %83 = vector.extract_strided_slice %0 {offsets = [0, 1, 0, 0], sizes = [2, 1, 2, 128], strides = [1, 1, 1, 1]} : vector<2x4x2x128xf32> to vector<2x1x2x128xf32>
    %84 = vector.shape_cast %83 : vector<2x1x2x128xf32> to vector<2x2x128xf32>
    %c2_30 = arith.constant 2 : index
    %c1_31 = arith.constant 1 : index
    %85 = memref.load %arg3[%c2_30, %c1_31] : memref<4x4xf32, #tpu.memory_space<smem>>
    %86 = vector.broadcast %85 : f32 to vector<2x2x128xf32>
    %87 = arith.mulf %84, %86 : vector<2x2x128xf32>
    %88 = arith.addf %82, %87 : vector<2x2x128xf32>
    %89 = vector.extract_strided_slice %0 {offsets = [0, 2, 0, 0], sizes = [2, 1, 2, 128], strides = [1, 1, 1, 1]} : vector<2x4x2x128xf32> to vector<2x1x2x128xf32>
    %90 = vector.shape_cast %89 : vector<2x1x2x128xf32> to vector<2x2x128xf32>
    %c2_32 = arith.constant 2 : index
    %c2_33 = arith.constant 2 : index
    %91 = memref.load %arg3[%c2_32, %c2_33] : memref<4x4xf32, #tpu.memory_space<smem>>
    %92 = vector.broadcast %91 : f32 to vector<2x2x128xf32>
    %93 = arith.mulf %90, %92 : vector<2x2x128xf32>
    %94 = arith.addf %88, %93 : vector<2x2x128xf32>
    %95 = vector.extract_strided_slice %0 {offsets = [0, 3, 0, 0], sizes = [2, 1, 2, 128], strides = [1, 1, 1, 1]} : vector<2x4x2x128xf32> to vector<2x1x2x128xf32>
    %96 = vector.shape_cast %95 : vector<2x1x2x128xf32> to vector<2x2x128xf32>
    %c2_34 = arith.constant 2 : index
    %c3_35 = arith.constant 3 : index
    %97 = memref.load %arg3[%c2_34, %c3_35] : memref<4x4xf32, #tpu.memory_space<smem>>
    %98 = vector.broadcast %97 : f32 to vector<2x2x128xf32>
    %99 = arith.mulf %96, %98 : vector<2x2x128xf32>
    %100 = arith.addf %94, %99 : vector<2x2x128xf32>
    %101 = arith.negf %100 : vector<2x2x128xf32>
    %102 = math.exp %101 : vector<2x2x128xf32>
    %cst_36 = arith.constant 1.000000e+00 : f32
    %103 = vector.broadcast %cst_36 : f32 to vector<2x2x128xf32>
    %104 = arith.addf %103, %102 : vector<2x2x128xf32>
    %105 = arith.divf %103, %104 : vector<2x2x128xf32>
    %106 = vector.extract_strided_slice %0 {offsets = [0, 2, 0, 0], sizes = [2, 1, 2, 128], strides = [1, 1, 1, 1]} : vector<2x4x2x128xf32> to vector<2x1x2x128xf32>
    %107 = vector.shape_cast %106 : vector<2x1x2x128xf32> to vector<2x2x128xf32>
    %108 = arith.mulf %107, %105 : vector<2x2x128xf32>
    %c0_37 = arith.constant 0 : index
    %c2_38 = arith.constant 2 : index
    %c0_39 = arith.constant 0 : index
    %c0_40 = arith.constant 0 : index
    %109 = vector.load %arg5[%c0_37, %c2_38, %c0_39, %c0_40] : memref<2x4x2x128xf32, #tpu.memory_space<vmem>>, vector<2x1x2x128xf32>
    %110 = vector.shape_cast %109 : vector<2x1x2x128xf32> to vector<2x2x128xf32>
    %111 = vector.shape_cast %108 : vector<2x2x128xf32> to vector<2x1x2x128xf32>
    tpu.vector_store %arg5[%c0_37, %c2_38, %c0_39, %c0_40], %111 {strides = array<i32>} : memref<2x4x2x128xf32, #tpu.memory_space<vmem>>, vector<2x1x2x128xf32>,
    %112 = vector.extract_strided_slice %0 {offsets = [0, 0, 0, 0], sizes = [2, 1, 2, 128], strides = [1, 1, 1, 1]} : vector<2x4x2x128xf32> to vector<2x1x2x128xf32>
    %113 = vector.shape_cast %112 : vector<2x1x2x128xf32> to vector<2x2x128xf32>
    %c3_41 = arith.constant 3 : index
    %c0_42 = arith.constant 0 : index
    %114 = memref.load %arg3[%c3_41, %c0_42] : memref<4x4xf32, #tpu.memory_space<smem>>
    %115 = vector.broadcast %114 : f32 to vector<2x2x128xf32>
    %116 = arith.mulf %113, %115 : vector<2x2x128xf32>
    %c3_43 = arith.constant 3 : index
    %117 = memref.load %arg4[%c3_43] : memref<4xf32, #tpu.memory_space<smem>>
    %118 = vector.broadcast %117 : f32 to vector<2x2x128xf32>
    %119 = arith.addf %116, %118 : vector<2x2x128xf32>
    %120 = vector.extract_strided_slice %0 {offsets = [0, 1, 0, 0], sizes = [2, 1, 2, 128], strides = [1, 1, 1, 1]} : vector<2x4x2x128xf32> to vector<2x1x2x128xf32>
    %121 = vector.shape_cast %120 : vector<2x1x2x128xf32> to vector<2x2x128xf32>
    %c3_44 = arith.constant 3 : index
    %c1_45 = arith.constant 1 : index
    %122 = memref.load %arg3[%c3_44, %c1_45] : memref<4x4xf32, #tpu.memory_space<smem>>
    %123 = vector.broadcast %122 : f32 to vector<2x2x128xf32>
    %124 = arith.mulf %121, %123 : vector<2x2x128xf32>
    %125 = arith.addf %119, %124 : vector<2x2x128xf32>
    %126 = vector.extract_strided_slice %0 {offsets = [0, 2, 0, 0], sizes = [2, 1, 2, 128], strides = [1, 1, 1, 1]} : vector<2x4x2x128xf32> to vector<2x1x2x128xf32>
    %127 = vector.shape_cast %126 : vector<2x1x2x128xf32> to vector<2x2x128xf32>
    %c3_46 = arith.constant 3 : index
    %c2_47 = arith.constant 2 : index
    %128 = memref.load %arg3[%c3_46, %c2_47] : memref<4x4xf32, #tpu.memory_space<smem>>
    %129 = vector.broadcast %128 : f32 to vector<2x2x128xf32>
    %130 = arith.mulf %127, %129 : vector<2x2x128xf32>
    %131 = arith.addf %125, %130 : vector<2x2x128xf32>
    %132 = vector.extract_strided_slice %0 {offsets = [0, 3, 0, 0], sizes = [2, 1, 2, 128], strides = [1, 1, 1, 1]} : vector<2x4x2x128xf32> to vector<2x1x2x128xf32>
    %133 = vector.shape_cast %132 : vector<2x1x2x128xf32> to vector<2x2x128xf32>
    %c3_48 = arith.constant 3 : index
    %c3_49 = arith.constant 3 : index
    %134 = memref.load %arg3[%c3_48, %c3_49] : memref<4x4xf32, #tpu.memory_space<smem>>
    %135 = vector.broadcast %134 : f32 to vector<2x2x128xf32>
    %136 = arith.mulf %133, %135 : vector<2x2x128xf32>
    %137 = arith.addf %131, %136 : vector<2x2x128xf32>
    %138 = arith.negf %137 : vector<2x2x128xf32>
    %139 = math.exp %138 : vector<2x2x128xf32>
    %cst_50 = arith.constant 1.000000e+00 : f32
    %140 = vector.broadcast %cst_50 : f32 to vector<2x2x128xf32>
    %141 = arith.addf %140, %139 : vector<2x2x128xf32>
    %142 = arith.divf %140, %141 : vector<2x2x128xf32>
    %143 = vector.extract_strided_slice %0 {offsets = [0, 3, 0, 0], sizes = [2, 1, 2, 128], strides = [1, 1, 1, 1]} : vector<2x4x2x128xf32> to vector<2x1x2x128xf32>
    %144 = vector.shape_cast %143 : vector<2x1x2x128xf32> to vector<2x2x128xf32>
    %145 = arith.mulf %144, %142 : vector<2x2x128xf32>
    %c0_51 = arith.constant 0 : index
    %c3_52 = arith.constant 3 : index
    %c0_53 = arith.constant 0 : index
    %c0_54 = arith.constant 0 : index
    %146 = vector.load %arg5[%c0_51, %c3_52, %c0_53, %c0_54] : memref<2x4x2x128xf32, #tpu.memory_space<vmem>>, vector<2x1x2x128xf32>
    %147 = vector.shape_cast %146 : vector<2x1x2x128xf32> to vector<2x2x128xf32>
    %148 = vector.shape_cast %145 : vector<2x2x128xf32> to vector<2x1x2x128xf32>
    tpu.vector_store %arg5[%c0_51, %c3_52, %c0_53, %c0_54], %148 {strides = array<i32>} : memref<2x4x2x128xf32, #tpu.memory_space<vmem>>, vector<2x1x2x128xf32>,
    return
  }
  func.func @transform_0(%arg0: i32, %arg1: i32) -> (i32, i32, i32, i32) {
    %c0_i32 = arith.constant 0 : i32
    %c0_i32_0 = arith.constant 0 : i32
    %c0_i32_1 = arith.constant 0 : i32
    return %arg0, %c0_i32, %arg1, %c0_i32_0 : i32, i32, i32, i32
  }
  func.func @transform_1(%arg0: i32, %arg1: i32) -> (i32, i32) {
    %c0_i32 = arith.constant 0 : i32
    %c0_i32_0 = arith.constant 0 : i32
    %c0_i32_1 = arith.constant 0 : i32
    return %c0_i32, %c0_i32_0 : i32, i32
  }
  func.func @transform_2(%arg0: i32, %arg1: i32) -> i32 {
    %c0_i32 = arith.constant 0 : i32
    %c0_i32_0 = arith.constant 0 : i32
    return %c0_i32 : i32
  }
  func.func @transform_3(%arg0: i32, %arg1: i32) -> (i32, i32, i32, i32) {
    %c0_i32 = arith.constant 0 : i32
    %c0_i32_0 = arith.constant 0 : i32
    %c0_i32_1 = arith.constant 0 : i32
    return %arg0, %c0_i32, %arg1, %c0_i32_0 : i32, i32, i32, i32
  }
}

</mosaic_0001>

<bundles_post_ra>
// kernel: tpu_custom_call.1
= control target key start
LH: loop header
LB: loop body
LE: loop exit
PB: predicated region body
PF: predicated region fallthrough
CT: control target
= control target key end

     0   :  { %8 = vsyncpa [#allocation3], 0  ;;  %s572_s0 = inlined_call_operand.hbm [shape: f32[2,4,2,128], index: 0, kind: input, shape index: {}]   ;;  %s573_s1 = inlined_call_operand.hbm [shape: f32[4,4], index: 1, kind: input, shape index: {}]   ;;  %s574_s2 = inlined_call_operand.vmem [shape: f32[4], index: 2, kind: input, shape index: {}]   ;;  %s575_s3 = inlined_call_operand.hbm [shape: f32[2,4,2,128], index: 3, kind: output, shape index: {}]  }
   0x1   :  { %9 = vsyncpa [#allocation5], 0 }
   0x2   :  { %10 = vsyncpa [#allocation6], 0 }
   0x3   :  { %11 = vsyncpa [#allocation4], 0  ;;  %s388_s12 = smov [#allocation2]   ;;  %s314_s16 = scalar_lea.hbm %s572_s0, 256 }
   0x4   :  { %s17_s13 = sshll.u32 %s388_s12, 4  ;;  %p315_p0 = scmp.ne.s32.totalorder %s572_s0, %s314_s16  ;;  %s18_s13 = int_to_ptr.vmem [resolvable:$true] %s17_s13 }
   0x5   :  { %p318_p1 = scmp.lt.u32.totalorder %s314_s16, %s572_s0 }
   0x7   :  { %p320_p2 = pnand %p318_p1, %p315_p0 }
   0x9   :  { %323 = shalt.err (!%p320_p2)
}
   0xa   :  { %s324_s21 = scalar_lea.vmem %s18_s13, 256  ;;  %p329_p4 = scmp.lt.s32.totalorder %s18_s13, %s18_s13 }
   0xb   :  { %p325_p3 = scmp.ne.s32.totalorder %s18_s13, %s324_s21  ;;  %p330_p5 = scmp.lt.s32.totalorder %s324_s21, %s324_s21 }
   0xd   :  { %p331_p6 = por %p330_p5, %p329_p4 }
   0xf   :  { %p332_p7 = pnand %p331_p6, %p325_p3 }
  0x11   :  { %335 = shalt.err (!%p332_p7)
}
  0x12   :  { %s389_s22 = smov 32   ;;  %s390_s23 = smov 2  }
  0x13   :  { %23 = dma.hbm_to_vmem [thread:$0]  %s572_s0, 256, %s18_s13, [#allocation3], %s389_s22, %s389_s22, %s390_s23  }
  0x14   :  { %s336_s28 = scalar_lea.hbm %s573_s1, 64 }
  0x15   :  { %p337_p8 = scmp.ne.s32.totalorder %s573_s1, %s336_s28  ;;  %p340_p9 = scmp.lt.u32.totalorder %s336_s28, %s573_s1 }
  0x17   :  { %p342_p10 = pnand %p340_p9, %p337_p8 }
  0x19   :  { %345 = shalt.err (!%p342_p10)
}
  0x1a   :  { %s391_s6 = smov [#allocation7]   ;;  %s38_s10 = sshll.u32 %s574_s2, 4  ;;  %s39_s10 = int_to_ptr.vmem [resolvable:$true] %s38_s10 }
  0x1b   :  { %31 = dma.hbm_to_smem %s573_s1, 64, %s391_s6, [#allocation5]  }
  0x1c   :  { %s346_s11 = scalar_lea.vmem %s39_s10, 16  ;;  %p351_p12 = scmp.lt.s32.totalorder %s39_s10, %s39_s10 }
  0x1d   :  { %p347_p11 = scmp.ne.s32.totalorder %s39_s10, %s346_s11  ;;  %p352_p13 = scmp.lt.s32.totalorder %s346_s11, %s346_s11 }
  0x1f   :  { %p353_p0 = por %p352_p13, %p351_p12 }
  0x21   :  { %p354_p1 = pnand %p353_p0, %p347_p11 }
  0x23   :  { %357 = shalt.err (!%p354_p1)
}
  0x24   :  { %s392_s12 = smov [#allocation8]  }
  0x25   :  { %41 = dma.vmem_to_smem %s39_s10, 16, %s392_s12, [#allocation6]  }
  0x26   :  { %380 = dma.done.wait [#allocation3], 256  }
  0x27   :  { %381 = vsyncadd [#allocation3], 4294967040 }
  0x28   :  { %382 = dma.done.wait [#allocation5], 64  }
  0x29   :  { %383 = vsyncadd [#allocation5], 4294967232 }
  0x2a   :  { %384 = dma.done.wait [#allocation6], 16  }
  0x2b   :  { %385 = vsyncadd [#allocation6], 4294967280 }
  0x2c   :  { %51 = sfence }
  0x2d   :  { %s60_s1 = sld [smem:[#allocation7]]  ;;  %s446_s2 = sld [smem:[#allocation7 + $0x1]]  ;;  %v450_v0 = vld [vmem:[#allocation2] sm:$0x3]  ;;  %v456_v1 = vld [vmem:[#allocation2 + $0x2] sm:$0x3] }
  0x2e   :  { %s444_s13 = sld [smem:[#allocation8]]  ;;  %s448_s14 = sld [smem:[#allocation7 + $0x2]]  ;;  %v466_v2 = vld [vmem:[#allocation2 + $0x8] sm:$0x3]  ;;  %v468_v3 = vld [vmem:[#allocation2 + $0x4] sm:$0x3] }
  0x2f   :  { %s452_s15 = sld [smem:[#allocation7 + $0x3]]  ;;  %s454_s16 = sld [smem:[#allocation7 + $0x80]]  ;;  %v474_v4 = vld [vmem:[#allocation2 + $0x6] sm:$0x3]  ;;  %v497_v27 = vld [vmem:[#allocation2 + $0xa] sm:$0x3] }
  0x30   :  { %s458_s17 = sld [smem:[#allocation8 + $0x1]]  ;;  %s462_s19 = sld [smem:[#allocation7 + $0x100]]  ;;  %v499_v28 = vld [vmem:[#allocation2 + $0xc] sm:$0x3]  ;;  %v507_v33 = vld [vmem:[#allocation2 + $0xe] sm:$0x3] }
  0x31   :  { %s460_s18 = sld [smem:[#allocation7 + $0x81]]  ;;  %s464_s20 = sld [smem:[#allocation8 + $0x2]] }
  0x32   :  { %s470_s21 = sld [smem:[#allocation7 + $0x101]]  ;;  %s472_s24 = sld [smem:[#allocation7 + $0x180]] }
  0x33   :  { %v61_v5 = vstv %s60_s1  ;;  %s477_s25 = sld [smem:[#allocation8 + $0x3]]  ;;  %s479_s26 = sld [smem:[#allocation7 + $0x181]]  ;;  %v69_v8 = vstv %s446_s2 }
  0x34   :  { %v65_v6 = vstv %s444_s13  ;;  %v62_v7 = vmul.f32 %v61_v5, %v450_v0  ;;  %v75_v9 = vstv %s448_s14  ;;  %v63_v10 = vmul.f32 %v61_v5, %v466_v2  ;;  %s501_s27 = sld [smem:[#allocation7 + $0x82]]  ;;  %s509_s28 = sld [smem:[#allocation7 + $0x83]] }
  0x35   :  { %v70_v11 = vmul.f32 %v69_v8, %v456_v1  ;;  %v76_v12 = vmul.f32 %v75_v9, %v468_v3  ;;  %v81_v13 = vstv %s452_s15  ;;  %v103_v14 = vstv %s454_s16  ;;  %s516_s29 = sld [smem:[#allocation7 + $0x102]]  ;;  %s518_s30 = sld [smem:[#allocation7 + $0x103]] }
  0x36   :  { %v66_v15 = vadd.f32 %v65_v6, %v62_v7  ;;  %v82_v16 = vmul.f32 %v81_v13, %v474_v4  ;;  %v104_v17 = vmul.f32 %v103_v14, %v450_v0  ;;  %v107_v18 = vstv %s458_s17  ;;  %s524_s4 = sld [smem:[#allocation7 + $0x182]]  ;;  %s529_s5 = sld [smem:[#allocation7 + $0x183]] }
  0x37   :  { %v111_v19 = vstv %s460_s18  ;;  %v146_v20 = vstv %s462_s19  ;;  %v150_v21 = vstv %s464_s20  ;;  %v67_v22 = vadd.f32 %v65_v6, %v63_v10  ;;  %s393_s6 = smov [#allocation9]  }
  0x38   :  { %v72_v23 = vadd.f32 %v70_v11, %v66_v15  ;;  %v108_v24 = vadd.f32 %v107_v18, %v104_v17  ;;  %v112_v25 = vmul.f32 %v111_v19, %v456_v1  ;;  %v147_v26 = vmul.f32 %v146_v20, %v450_v0  ;;  %s236_s7 = sshll.u32 %s393_s6, 4  ;;  %s237_s7 = int_to_ptr.vmem [resolvable:$true] %s236_s7 }
  0x39   :  { %v154_v29 = vstv %s470_s21  ;;  %v189_v30 = vstv %s472_s24  ;;  %v193_v31 = vstv %s477_s25  ;;  %v197_v32 = vstv %s479_s26  ;;  %s358_s8 = scalar_lea.vmem %s237_s7, 256  ;;  %p363_p3 = scmp.lt.s32.totalorder %s237_s7, %s237_s7 }
  0x3a   :  { %v78_v34 = vadd.f32 %v76_v12, %v72_v23  ;;  %v114_v35 = vadd.f32 %v112_v25, %v108_v24  ;;  %v151_v36 = vadd.f32 %v150_v21, %v147_v26  ;;  %v155_v37 = vmul.f32 %v154_v29, %v456_v1  ;;  %p359_p2 = scmp.ne.s32.totalorder %s237_s7, %s358_s8  ;;  %p364_p4 = scmp.lt.s32.totalorder %s358_s8, %s358_s8 }
  0x3b   :  { %v190_v38 = vmul.f32 %v189_v30, %v450_v0  ;;  %v198_v39 = vmul.f32 %v197_v32, %v456_v1  ;;  %v71_v40 = vmul.f32 %v69_v8, %v497_v27  ;;  %v77_v41 = vmul.f32 %v75_v9, %v499_v28 }
  0x3c   :  { %v84_v42 = vadd.f32 %v82_v16, %v78_v34  ;;  %v157_v43 = vadd.f32 %v155_v37, %v151_v36  ;;  %v83_v44 = vmul.f32 %v81_v13, %v507_v33  ;;  %v105_v45 = vmul.f32 %v103_v14, %v466_v2  ;;  %p365_p5 = por %p364_p4, %p363_p3 }
  0x3d   :  { %v194_v46 = vadd.f32 %v193_v31, %v190_v38  ;;  %v73_v47 = vadd.f32 %v71_v40, %v67_v22  ;;  %v113_v48 = vmul.f32 %v111_v19, %v497_v27  ;;  %v148_v49 = vmul.f32 %v146_v20, %v466_v2 }
  0x3e   :  { %v253_v50 = vmul.f32 -1.442695, %v84_v42  ;;  %v109_v51 = vadd.f32 %v107_v18, %v105_v45  ;;  %v156_v52 = vmul.f32 %v154_v29, %v497_v27  ;;  %v191_v53 = vmul.f32 %v189_v30, %v466_v2  ;;  %p366_p6 = pnand %p365_p5, %p359_p2 }
  0x3f   :  { %v200_v54 = vadd.f32 %v198_v39, %v194_v46  ;;  %v79_v55 = vadd.f32 %v77_v41, %v73_v47  ;;  %v152_v56 = vadd.f32 %v150_v21, %v148_v49  ;;  %v199_v57 = vmul.f32 %v197_v32, %v497_v27 }
  0x40   :  { %282 = vpow2.f32 %v253_v50  ;;  %v115_v58 = vadd.f32 %v113_v48, %v109_v51  ;;  %v195_v59 = vadd.f32 %v193_v31, %v191_v53  ;;  %v117_v60 = vstv %s501_s27 }
  0x41   :  { %v85_v61 = vadd.f32 %v83_v44, %v79_v55  ;;  %v158_v62 = vadd.f32 %v156_v52, %v152_v56  ;;  %v118_v63 = vmul.f32 %v117_v60, %v468_v3  ;;  %v123_v5 = vstv %s509_s28 }
  0x42   :  { %v201_v6 = vadd.f32 %v199_v57, %v195_v59  ;;  %v124_v7 = vmul.f32 %v123_v5, %v474_v4  ;;  %v119_v8 = vmul.f32 %v117_v60, %v499_v28  ;;  %v125_v9 = vmul.f32 %v123_v5, %v507_v33 }
  0x43   :  { %v254_v10 = vmul.f32 -1.442695, %v85_v61  ;;  %v120_v11 = vadd.f32 %v118_v63, %v114_v35  ;;  %v160_v12 = vstv %s516_s29  ;;  %v166_v13 = vstv %s518_s30 }
  0x44   :  { %v121_v14 = vadd.f32 %v119_v8, %v115_v58  ;;  %v161_v15 = vmul.f32 %v160_v12, %v468_v3  ;;  %v167_v16 = vmul.f32 %v166_v13, %v474_v4  ;;  %v162_v17 = vmul.f32 %v160_v12, %v499_v28 }
  0x45   :  { %284 = vpow2.f32 %v254_v10  ;;  %v126_v18 = vadd.f32 %v124_v7, %v120_v11  ;;  %v168_v19 = vmul.f32 %v166_v13, %v507_v33  ;;  %v203_v20 = vstv %s524_s4 }
  0x46   :  { %v127_v21 = vadd.f32 %v125_v9, %v121_v14  ;;  %v163_v22 = vadd.f32 %v161_v15, %v157_v43  ;;  %v164_v23 = vadd.f32 %v162_v17, %v158_v62  ;;  %v204_v24 = vmul.f32 %v203_v20, %v468_v3 }
  0x47   :  { %v260_v25 = vmul.f32 -1.442695, %v126_v18  ;;  %v209_v26 = vstv %s529_s5  ;;  %v205_v29 = vmul.f32 %v203_v20, %v499_v28 }
  0x48   :  { %v261_v30 = vmul.f32 -1.442695, %v127_v21  ;;  %v169_v31 = vadd.f32 %v167_v16, %v163_v22  ;;  %v170_v32 = vadd.f32 %v168_v19, %v164_v23  ;;  %v206_v34 = vadd.f32 %v204_v24, %v200_v54 }
  0x49   :  { %286 = vpow2.f32 %v260_v25  ;;  %v210_v35 = vmul.f32 %v209_v26, %v474_v4  ;;  %v207_v36 = vadd.f32 %v205_v29, %v201_v6  ;;  %v211_v37 = vmul.f32 %v209_v26, %v507_v33 }
  0x4a   :  { %v283_v38 = vpop.eup %282  ;;  %288 = vpow2.f32 %v261_v30  ;;  %v267_v39 = vmul.f32 -1.442695, %v169_v31  ;;  %v268_v40 = vmul.f32 -1.442695, %v170_v32 }
  0x4b   :  { %v92_v41 = vadd.f32 1.0, %v283_v38  ;;  %v212_v42 = vadd.f32 %v210_v35, %v206_v34  ;;  %v213_v43 = vadd.f32 %v211_v37, %v207_v36 }
  0x4c   :  { %290 = vpow2.f32 %v267_v39 }
  0x4d   :  { %292 = vrcp.f32 %v92_v41  ;;  %v274_v44 = vmul.f32 -1.442695, %v212_v42  ;;  %v275_v45 = vmul.f32 -1.442695, %v213_v43 }
  0x4e   :  { %294 = vpow2.f32 %v268_v40 }
  0x4f   :  { %v285_v46 = vpop.eup %284  ;;  %296 = vpow2.f32 %v274_v44 }
  0x50   :  { %v93_v47 = vadd.f32 1.0, %v285_v46  ;;  %298 = vpow2.f32 %v275_v45 }
  0x52   :  { %300 = vrcp.f32 %v93_v47 }
  0x53   :  { %v287_v48 = vpop.eup %286 }
  0x54   :  { %v289_v49 = vpop.eup %288  ;;  %v134_v50 = vadd.f32 1.0, %v287_v48 }
  0x55   :  { %v135_v51 = vadd.f32 1.0, %v289_v49 }
  0x56   :  { %v291_v52 = vpop.eup %290  ;;  %302 = vrcp.f32 %v134_v50 }
  0x57   :  { %v293_v53 = vpop.eup %292  ;;  %304 = vrcp.f32 %v135_v51  ;;  %v177_v54 = vadd.f32 1.0, %v291_v52 }
  0x58   :  { %v295_v55 = vpop.eup %294  ;;  %v98_v56 = vmul.f32 %v293_v53, %v450_v0 }
  0x59   :  { %v297_v57 = vpop.eup %296  ;;  %306 = vrcp.f32 %v177_v54  ;;  %v178_v58 = vadd.f32 1.0, %v295_v55 }
  0x5a   :  { %v299_v59 = vpop.eup %298  ;;  %100 = vst [vmem:[#allocation9] sm:$0x3] %v98_v56  ;;  %v220_v60 = vadd.f32 1.0, %v297_v57 }
  0x5b   :  { %308 = vrcp.f32 %v178_v58  ;;  %v221_v61 = vadd.f32 1.0, %v299_v59 }
  0x5c   :  { %v301_v62 = vpop.eup %300  ;;  %310 = vrcp.f32 %v220_v60 }
  0x5d   :  { %v99_v63 = vmul.f32 %v301_v62, %v466_v2  ;;  %312 = vrcp.f32 %v221_v61 }
  0x5f   :  { %101 = vst [vmem:[#allocation9 + $0x8] sm:$0x3] %v99_v63 }
  0x60   :  { %v303_v5 = vpop.eup %302 }
  0x61   :  { %v305_v6 = vpop.eup %304  ;;  %v140_v7 = vmul.f32 %v303_v5, %v456_v1 }
  0x62   :  { %v141_v0 = vmul.f32 %v305_v6, %v497_v27 }
  0x63   :  { %v307_v8 = vpop.eup %306  ;;  %143 = vst [vmem:[#allocation9 + $0x2] sm:$0x3] %v140_v7 }
  0x64   :  { %144 = vst [vmem:[#allocation9 + $0xa] sm:$0x3] %v141_v0  ;;  %v183_v9 = vmul.f32 %v307_v8, %v468_v3 }
  0x65   :  { %v309_v10 = vpop.eup %308 }
  0x66   :  { %v311_v11 = vpop.eup %310  ;;  %186 = vst [vmem:[#allocation9 + $0x4] sm:$0x3] %v183_v9  ;;  %v184_v2 = vmul.f32 %v309_v10, %v499_v28 }
  0x67   :  { %v313_v12 = vpop.eup %312  ;;  %v226_v13 = vmul.f32 %v311_v11, %v474_v4 }
  0x68   :  { %187 = vst [vmem:[#allocation9 + $0xc] sm:$0x3] %v184_v2  ;;  %v227_v1 = vmul.f32 %v313_v12, %v507_v33 }
  0x69   :  { %229 = vst [vmem:[#allocation9 + $0x6] sm:$0x3] %v226_v13 }
  0x6a   :  { %230 = vst [vmem:[#allocation9 + $0xe] sm:$0x3] %v227_v1 }
  0x6b   :  { %369 = shalt.err (!%p366_p6)
}
  0x6c   :  { %s370_s10 = scalar_lea.hbm %s575_s3, 256 }
  0x6d   :  { %p371_p7 = scmp.ne.s32.totalorder %s575_s3, %s370_s10  ;;  %p374_p8 = scmp.lt.u32.totalorder %s370_s10, %s575_s3 }
  0x6f   :  { %p376_p9 = pnand %p374_p8, %p371_p7 }
  0x71   :  { %379 = shalt.err (!%p376_p9)
}
  0x72   :  { %242 = dma.vmem_to_hbm [thread:$0]  %s237_s7, 256, %s575_s3, [#allocation4], %s389_s22, %s389_s22, %s390_s23  }
  0x73   :  { %386 = dma.done.wait [#allocation4], 256  }
  0x74   :  { %387 = vsyncadd [#allocation4], 4294967040 }
  0x75   :  { %246 = vsyncpa [#allocation3], 1 }
  0x76   :  { %247 = vsyncpa [#allocation4], 1 }
  0x77   :  { %248 = vsyncpa [#allocation5], 1 }
  0x78   :  { %249 = vsyncpa [#allocation6], 1 }

</bundles_post_ra>
